<compile_context>
chip_gen: v7x
topology: tpu7x:2x2x1
jax: 0.10.0
libtpu: 0.0.40
codegen_flags: <defaults>
</compile_context>

<pallas_src>
import jax
import jax.numpy as jnp
from jax.experimental import pallas as pl
from jax.experimental.pallas import tpu as pltpu

# Tile caps (bf16 operands, f32 output). Sized for the smallest VMEM budget
# (v7x): h 512x1024x2B (x2 buf) + W 1024x1024x2B (x2 buf) + out 512x1024x4B
# (x2 buf) ~= 10-12 MiB, well under the 32 MiB scoped limit.
TM_MAX = 512
TN_MAX = 1024
TK_MAX = 1024

M_GRANULE = 16    # bf16 sublane packing (also a multiple of f32's 8)
LANE_GRANULE = 128


def _round_up(x, m):
    return ((x + m - 1) // m) * m


def _largest_divisor_tile(extent, granule, cap):
    """Largest multiple of `granule` that divides `extent` and is <= cap.

    `extent` must itself be a multiple of `granule` (guaranteed by padding).
    """
    t = min(extent, cap)
    t = (t // granule) * granule
    while extent % t != 0:
        t -= granule
    return t


def prepare_linear_params(weight, bias, compute_dtype=jnp.bfloat16):
    """One-time parameter prep (do NOT call per forward step).

    Args:
      weight: (d_out, d_in) float32 (PyTorch nn.Linear convention)
      bias:   (d_out,) float32
    Returns:
      w_pad: (k_pad, n_pad) compute_dtype — transposed + zero-padded, lane-dense
      b_pad: (1, n_pad) float32          — zero-padded bias row (kept f32)
    """
    d_out, d_in = weight.shape
    k_pad = _round_up(d_in, LANE_GRANULE)
    n_pad = _round_up(d_out, LANE_GRANULE)
    w_pad = jnp.zeros((k_pad, n_pad), compute_dtype)
    w_pad = w_pad.at[:d_in, :d_out].set(weight.T.astype(compute_dtype))
    b_pad = jnp.zeros((1, n_pad), jnp.float32).at[0, :d_out].set(
        bias.astype(jnp.float32))
    return w_pad, b_pad


def _linear_bias_kernel_single_k(h_ref, w_ref, b_ref, o_ref):
    """grid_k == 1: one branch-free dot + bias per output tile."""
    o_ref[...] = (
        jnp.dot(h_ref[...], w_ref[...], preferred_element_type=jnp.float32)
        + b_ref[...]
    )


def _linear_bias_kernel_multi_k(h_ref, w_ref, b_ref, o_ref):
    """grid_k > 1: accumulate directly into the resident f32 output block."""
    k = pl.program_id(2)
    partial = jnp.dot(h_ref[...], w_ref[...],
                      preferred_element_type=jnp.float32)

    @pl.when(k == 0)
    def _first():
        o_ref[...] = partial + b_ref[...]

    @pl.when(k > 0)
    def _rest():
        o_ref[...] += partial


def baseline_network_forward(h_t, w_pad, b_pad, d_out, *, force_pallas=False):
    """Pallas equivalent of nn.Linear(...)(h_t.detach()).

    Args:
      h_t:   (batch, d_in) float32
      w_pad: (k_pad, n_pad) bf16 from prepare_linear_params
      b_pad: (1, n_pad) float32 from prepare_linear_params
      d_out: true (unpadded) output size
      force_pallas: bypass the tiny-shape fast path (used by the demo/tests)
    Returns:
      (batch, d_out) float32
    """
    batch, d_in = h_t.shape
    k_pad, n_pad = w_pad.shape

    # detach() -> stop_gradient; forward values unchanged.
    h_t = jax.lax.stop_gradient(h_t)
    h_c = h_t.astype(w_pad.dtype)

    # Tiny shapes: a standalone pallas_call is pure launch/pad overhead.
    if not force_pallas and batch * k_pad * n_pad < (128 * 128 * 128):
        return jnp.dot(h_c, w_pad[:d_in, :d_out],
                       preferred_element_type=jnp.float32) + b_pad[0, :d_out]

    # Pad to hardware granularity only (16 on M, 128 on K/N), then pick tiles
    # that divide the padded extents — never pad up to tile size.
    m_pad = _round_up(batch, M_GRANULE)
    tm = _largest_divisor_tile(m_pad, M_GRANULE, TM_MAX)
    tk = _largest_divisor_tile(k_pad, LANE_GRANULE, TK_MAX)
    tn = _largest_divisor_tile(n_pad, LANE_GRANULE, TN_MAX)

    # Zero-pad activations (K padding is required so garbage columns can never
    # contaminate the reduction; ideally fused into the producer of h_t).
    if (m_pad, k_pad) != (batch, d_in):
        h_in = jnp.zeros((m_pad, k_pad), h_c.dtype).at[:batch, :d_in].set(h_c)
    else:
        h_in = h_c

    grid = (m_pad // tm, n_pad // tn, k_pad // tk)
    kernel = (_linear_bias_kernel_single_k if grid[2] == 1
              else _linear_bias_kernel_multi_k)

    flops = 2 * m_pad * k_pad * n_pad
    bytes_accessed = (
        m_pad * k_pad * h_in.dtype.itemsize        # h
        + k_pad * n_pad * w_pad.dtype.itemsize     # W^T
        + n_pad * 4                                # bias
        + m_pad * n_pad * 4                        # output
    )

    out = pl.pallas_call(
        kernel,
        out_shape=jax.ShapeDtypeStruct((m_pad, n_pad), jnp.float32),
        grid_spec=pltpu.PrefetchScalarGridSpec(
            num_scalar_prefetch=0,
            grid=grid,
            in_specs=[
                pl.BlockSpec((tm, tk), lambda i, j, k: (i, k)),   # h (bf16)
                pl.BlockSpec((tk, tn), lambda i, j, k: (k, j)),   # W^T (bf16)
                pl.BlockSpec((1, tn), lambda i, j, k: (0, j)),    # bias row
            ],
            out_specs=pl.BlockSpec((tm, tn), lambda i, j, k: (i, j)),
        ),
        compiler_params=pltpu.CompilerParams(
            # On v7x, M could be marked CORE_PARALLEL to shard across the two
            # TensorCores; "parallel" is kept here for portability.
            dimension_semantics=("parallel", "parallel", "arbitrary"),
            vmem_limit_bytes=32 << 20,
        ),
        cost_estimate=pl.CostEstimate(flops=flops, transcendentals=0,
                                      bytes_accessed=bytes_accessed),
    )(h_in, w_pad, b_pad)

    if (m_pad, n_pad) != (batch, d_out):
        out = out[:batch, :d_out]
    return out


if __name__ == "__main__":
    # Small shapes consistent with the module: h_t is (batch, input_size).
    batch = 2
    input_size = 32
    output_size = 8

    key = jax.random.PRNGKey(0)
    k_h, k_w, k_b = jax.random.split(key, 3)

    h_t = jax.random.normal(k_h, (batch, input_size), dtype=jnp.float32)

    # Deterministic synthetic parameters (mimic nn.Linear uniform init bound).
    bound = 1.0 / (input_size ** 0.5)
    weight = jax.random.uniform(
        k_w, (output_size, input_size), minval=-bound, maxval=bound,
        dtype=jnp.float32)
    bias = jax.random.uniform(
        k_b, (output_size,), minval=-bound, maxval=bound, dtype=jnp.float32)

    # One-time parameter prep (transpose + lane-dense padding + bf16 cast).
    w_pad, b_pad = prepare_linear_params(weight, bias)

    # Force the Pallas path so the kernel is exercised at these small shapes.
    fwd = jax.jit(lambda h, w, b: baseline_network_forward(
        h, w, b, output_size, force_pallas=True))

    b_t = fwd(h_t, w_pad, b_pad)
    b_t = jax.block_until_ready(b_t)
    assert b_t.shape == (batch, output_size)
    assert b_t.dtype == jnp.float32

    # Reference with the same bf16-operand / f32-accumulate math.
    ref_bf16 = jnp.dot(h_t.astype(jnp.bfloat16), weight.T.astype(jnp.bfloat16),
                       preferred_element_type=jnp.float32) + bias
    assert jnp.allclose(b_t, ref_bf16, atol=1e-4, rtol=1e-4)

    # Loose check against the pure-f32 reference (bf16 operand rounding).
    ref_f32 = h_t @ weight.T + bias
    assert jnp.allclose(b_t, ref_f32, atol=5e-2, rtol=5e-2)

    print("KERNEL_OK")
</pallas_src>

<mosaic_0001>
module attributes {stable_mosaic.version = 11 : i64} {
  func.func @_linear_bias_kernel_single_k(%arg0: i32, %arg1: i32, %arg2: i32, %arg3: memref<16x128xbf16, #tpu.memory_space<vmem>>, %arg4: memref<128x128xbf16, #tpu.memory_space<vmem>>, %arg5: memref<1x128xf32, #tpu.memory_space<vmem>>, %arg6: memref<16x128xf32, #tpu.memory_space<vmem>>) attributes {dimension_semantics = [#tpu.dimension_semantics<parallel>, #tpu.dimension_semantics<parallel>, #tpu.dimension_semantics<arbitrary>], iteration_bounds = array<i64: 1, 1, 1>, scalar_prefetch = 0 : i64, scratch_operands = 0 : i64, tpu.core_type = #tpu.core_type<tc>, window_params = [{transform_indices = @transform_0, window_bounds = array<i64: 16, 128>}, {transform_indices = @transform_1, window_bounds = array<i64: 128, 128>}, {transform_indices = @transform_2, window_bounds = array<i64: 1, 128>}, {transform_indices = @transform_3, window_bounds = array<i64: 16, 128>}]} {
    %c0 = arith.constant 0 : index
    %c0_0 = arith.constant 0 : index
    %0 = vector.load %arg3[%c0, %c0_0] : memref<16x128xbf16, #tpu.memory_space<vmem>>, vector<16x128xbf16>
    %c0_1 = arith.constant 0 : index
    %c0_2 = arith.constant 0 : index
    %1 = vector.load %arg4[%c0_1, %c0_2] : memref<128x128xbf16, #tpu.memory_space<vmem>>, vector<128x128xbf16>
    %cst = arith.constant dense<0.000000e+00> : vector<16x128xf32>
    %2 = tpu.matmul %0, %1, %cst {dimension_numbers = #tpu.dot_dimension_numbers<[1], [0], [0], [1], [0, 0, 1, 1], [], []>} : vector<16x128xbf16>, vector<128x128xbf16>, vector<16x128xf32> -> vector<16x128xf32>
    %c0_3 = arith.constant 0 : index
    %c0_4 = arith.constant 0 : index
    %3 = vector.load %arg5[%c0_3, %c0_4] : memref<1x128xf32, #tpu.memory_space<vmem>>, vector<1x128xf32>
    %4 = vector.broadcast %3 : vector<1x128xf32> to vector<16x128xf32>
    %5 = arith.addf %2, %4 : vector<16x128xf32>
    %c0_5 = arith.constant 0 : index
    %c0_6 = arith.constant 0 : index
    %6 = vector.load %arg6[%c0_5, %c0_6] : memref<16x128xf32, #tpu.memory_space<vmem>>, vector<16x128xf32>
    tpu.vector_store %arg6[%c0_5, %c0_6], %5 {strides = array<i32>} : memref<16x128xf32, #tpu.memory_space<vmem>>, vector<16x128xf32>,
    return
  }
  func.func @transform_0(%arg0: i32, %arg1: i32, %arg2: i32) -> (i32, i32) {
    %c0_i32 = arith.constant 0 : i32
    return %arg0, %arg2 : i32, i32
  }
  func.func @transform_1(%arg0: i32, %arg1: i32, %arg2: i32) -> (i32, i32) {
    %c0_i32 = arith.constant 0 : i32
    return %arg2, %arg1 : i32, i32
  }
  func.func @transform_2(%arg0: i32, %arg1: i32, %arg2: i32) -> (i32, i32) {
    %c0_i32 = arith.constant 0 : i32
    %c0_i32_0 = arith.constant 0 : i32
    return %c0_i32, %arg1 : i32, i32
  }
  func.func @transform_3(%arg0: i32, %arg1: i32, %arg2: i32) -> (i32, i32) {
    %c0_i32 = arith.constant 0 : i32
    return %arg0, %arg1 : i32, i32
  }
}

</mosaic_0001>

<bundles_post_ra>
// kernel: _lambda_.1
= control target key start
LH: loop header
LB: loop body
LE: loop exit
PB: predicated region body
PF: predicated region fallthrough
CT: control target
= control target key end

     0   :  { %8 = vsyncpa [#allocation3], 0  ;;  %s233_s12 = smov [#allocation2]   ;;  %s282_s0 = inlined_call_operand.vmem [shape: bf16[16,128], index: 0, kind: input, shape index: {}]   ;;  %s283_s1 = inlined_call_operand.hbm [shape: bf16[128,128], index: 1, kind: input, shape index: {}]   ;;  %s284_s2 = inlined_call_operand.vmem [shape: f32[1,128], index: 2, kind: input, shape index: {}]   ;;  %s285_s3 = inlined_call_operand.vmem [shape: f32[16,128], index: 3, kind: output, shape index: {}]  }
   0x1   :  { %s16_s13 = sshll.u32 %s233_s12, 4  ;;  %s209_s16 = scalar_lea.hbm %s283_s1, 1024  ;;  %s17_s13 = int_to_ptr.vmem [resolvable:$true] %s16_s13 }
   0x2   :  { %p210_p0 = scmp.ne.s32.totalorder %s283_s1, %s209_s16  ;;  %p213_p1 = scmp.lt.u32.totalorder %s209_s16, %s283_s1 }
   0x4   :  { %p215_p2 = pnand %p213_p1, %p210_p0 }
   0x6   :  { %218 = shalt.err (!%p215_p2)
}
   0x7   :  { %s219_s21 = scalar_lea.vmem %s17_s13, 1024  ;;  %p224_p4 = scmp.lt.s32.totalorder %s17_s13, %s17_s13 }
   0x8   :  { %p220_p3 = scmp.ne.s32.totalorder %s17_s13, %s219_s21  ;;  %p225_p5 = scmp.lt.s32.totalorder %s219_s21, %s219_s21 }
   0xa   :  { %p226_p6 = por %p225_p5, %p224_p4 }
   0xc   :  { %p227_p7 = pnand %p226_p6, %p220_p3 }
   0xe   :  { %230 = shalt.err (!%p227_p7)
}
   0xf   :  { %s234_s22 = smov 64   ;;  %s235_s23 = smov 4  }
  0x10   :  { %22 = dma.hbm_to_vmem [thread:$0]  %s283_s1, 1024, %s17_s13, [#allocation3], %s234_s22, %s234_s22, %s235_s23  }
  0x11   :  { %231 = dma.done.wait [#allocation3], 1024  }
  0x12   :  { %232 = vsyncadd [#allocation3], 4294966272  ;;  %v236_v0 = vmov 0.0   ;;  %vm237_vm0 = vmmov 0   ;;  %v200_v1 = vld [vmem:[#allocation2] sm:$0xff]   ;;  %v201_v2 = vld [vmem:[#allocation2 + $0x8] sm:$0xff]  }
  0x13   :  { %175 = vmatprep.subr.bf16.mxu0 %v236_v0  ;;  %191 = vmatprep.mubr.msk.bf16.mxu0 %vm237_vm0, %v236_v0  ;;  %v202_v3 = vld [vmem:[#allocation2 + $0x10] sm:$0xff]   ;;  %v203_v4 = vld [vmem:[#allocation2 + $0x18] sm:$0xff]   ;;  %v204_v5 = vld [vmem:[#allocation2 + $0x20] sm:$0xff]  }
  0x14   :  { %176 = vmatpush3.bf16.msra.mxu0 %v200_v1  ;;  %v205_v6 = vld [vmem:[#allocation2 + $0x28] sm:$0xff]   ;;  %v206_v7 = vld [vmem:[#allocation2 + $0x30] sm:$0xff]   ;;  %v207_v8 = vld [vmem:[#allocation2 + $0x38] sm:$0xff]  }
  0x15   :  { %177 = vmatprep.subr.bf16.mxu0 %v236_v0  ;;  %v208_v9 = vld [vmem:[%s282_s0] sm:$0xff]  }
  0x16   :  { %v156_v10 = vld [vmem:[%s284_s2] ss:$0 sm:$0xff] }
  0x18   :  { %178 = vmatpush3.bf16.msra.mxu0 %v201_v2 }
  0x19   :  { %179 = vmatprep.subr.bf16.mxu0 %v236_v0 }
  0x1c   :  { %180 = vmatpush3.bf16.msra.mxu0 %v202_v3 }
  0x1d   :  { %181 = vmatprep.subr.bf16.mxu0 %v236_v0 }
  0x20   :  { %182 = vmatpush3.bf16.msra.mxu0 %v203_v4 }
  0x21   :  { %183 = vmatprep.subr.bf16.mxu0 %v236_v0 }
  0x24   :  { %184 = vmatpush3.bf16.msra.mxu0 %v204_v5 }
  0x25   :  { %185 = vmatprep.subr.bf16.mxu0 %v236_v0 }
  0x28   :  { %186 = vmatpush3.bf16.msra.mxu0 %v205_v6 }
  0x29   :  { %187 = vmatprep.subr.bf16.mxu0 %v236_v0 }
  0x2c   :  { %188 = vmatpush3.bf16.msra.mxu0 %v206_v7 }
  0x2d   :  { %189 = vmatprep.subr.bf16.mxu0 %v236_v0 }
  0x30   :  { %190 = vmatpush3.bf16.msra.mxu0 %v207_v8 }
  0x33   :  { %192 = vmatmul.mubr.bf16.vlgmr.msra.gmra.mrb[0].mxu0 %v208_v9 }
 0x106   :  { %v142_v11 = vpop.f32.mrb[0].mxu0 }
 0x107   :  { %v143_v12 = vadd.f32 %v156_v10, %v142_v11  ;;  %v193_v13 = vpop.f32.mrb[1].mxu0 }
 0x108   :  { %v145_v14 = vpop.f32.mrb[2].mxu0 }
 0x109   :  { %149 = vst [vmem:[%s285_s3] sm:$0xff] %v143_v12  ;;  %v146_v15 = vadd.f32 %v156_v10, %v145_v14  ;;  %v194_v16 = vpop.f32.mrb[3].mxu0 }
 0x10b   :  { %150 = vst [vmem:[%s285_s3 + $0x8] sm:$0xff] %v146_v15 }
 0x10c   :  { %155 = vsyncpa [#allocation3], 1 }

</bundles_post_ra>
